<compile_context>
chip_gen: v5e
topology: v5e:2x2
jax: 0.10.0
libtpu: 0.0.40
codegen_flags: <defaults>
</compile_context>

<pallas_src>
import functools
import math

import jax
import jax.numpy as jnp
from jax.experimental import pallas as pl
from jax.experimental.pallas import tpu as pltpu


def _row_block(n, target=512):
    """Largest row-block <= target that evenly divides n (whole array if n <= target)."""
    if n <= target:
        return n
    b = target
    while b >= 8:
        if n % b == 0:
            return b
        b //= 2
    return n


# ----------------------------- Pallas kernels ------------------------------

def _typed_linear_kernel(x_ref, w_ref, b_ref, mask_ref, o_ref, *, num_types, activation):
    """out[n] = act(x[n] @ W[type[n]] + b[type[n]]) via one-hot masked sum over node types.

    Matmul operands in bf16 (f32 accumulation); bias/activation/masking in f32.
    """
    x = x_ref[...].astype(jnp.bfloat16)           # (bn, Din)
    mask = mask_ref[...]                          # (bn, T) one-hot f32
    acc = None
    for t in range(num_types):
        y = jnp.dot(x, w_ref[t], preferred_element_type=jnp.float32) + b_ref[t:t + 1, :]
        if activation == "tanh":
            y = jnp.tanh(y)
        contrib = mask[:, t:t + 1] * y
        acc = contrib if t == 0 else acc + contrib
    o_ref[...] = acc                              # single lane-dense store


def _edge_relation_kernel(q_ref, k_ref, v_ref, ratt_ref, rmsg_ref, hpri_ref, emask_ref,
                          att_ref, msg_ref, *, num_relations):
    """Per-edge HGT attention scores and messages, all heads at once.

    q/k/v: (be, n_hid) gathered edge tensors (head h occupies columns [h*dk, (h+1)*dk)).
    ratt/rmsg: (R, n_hid, n_hid) block-diagonal relation matrices (bf16).
    hpri: (R, n_hid, H) head-sum matrices with rel_pri[r,h]/sqrt(dk) folded in (f32).
    emask: (be, R) one-hot relation mask. Outputs: att (be, H), msg (be, n_hid).
    """
    q = q_ref[...]                                 # f32 (kept f32 for the VPU product)
    k = k_ref[...].astype(jnp.bfloat16)
    v = v_ref[...].astype(jnp.bfloat16)
    emask = emask_ref[...]
    s_acc = None
    m_acc = None
    for r in range(num_relations):
        # All-heads key transform: (be, n_hid) @ blockdiag(rel_att[r]) -> (be, n_hid)
        k_rel = jnp.dot(k, ratt_ref[r], preferred_element_type=jnp.float32)
        qk = q * k_rel                             # f32 elementwise
        # All-heads score reduce (+ prior scaling) in one MXU pass: (be, n_hid)@(n_hid, H)
        s_r = jnp.dot(qk, hpri_ref[r], preferred_element_type=jnp.float32)
        # All-heads message transform: (be, n_hid) @ blockdiag(rel_msg[r]) -> (be, n_hid)
        m_r = jnp.dot(v, rmsg_ref[r], preferred_element_type=jnp.float32)
        mcol = emask[:, r:r + 1]
        if r == 0:
            s_acc = mcol * s_r
            m_acc = mcol * m_r
        else:
            s_acc = s_acc + mcol * s_r
            m_acc = m_acc + mcol * m_r
    att_ref[...] = s_acc                           # single whole-tile stores
    msg_ref[...] = m_acc


def _update_kernel(aggr_ref, xin_ref, gate_ref, w_ref, b_ref, mask_ref, o_ref, *, num_types):
    """HGTConv.update: exact gelu -> per-type a_linear -> sigmoid(skip)-gated residual."""
    aggr = aggr_ref[...]
    g = 0.5 * aggr * (1.0 + jax.lax.erf(aggr * (1.0 / math.sqrt(2.0))))   # exact gelu, f32
    g_bf = g.astype(jnp.bfloat16)
    mask = mask_ref[...]                          # (bn, T)
    trans = None
    for t in range(num_types):
        y = jnp.dot(g_bf, w_ref[t], preferred_element_type=jnp.float32) + b_ref[t:t + 1, :]
        contrib = mask[:, t:t + 1] * y
        trans = contrib if t == 0 else trans + contrib
    gate = gate_ref[...]                          # (bn, 1): sigmoid(skip[type[n]])
    o_ref[...] = trans * gate + xin_ref[...] * (1.0 - gate)


# ----------------------------- Pallas wrappers ------------------------------

_PARALLEL_1D = pltpu.CompilerParams(dimension_semantics=("parallel",))


def typed_linear(x, w, b, type_mask, activation="none", block_rows=512):
    n, din = x.shape
    t, _, dout = w.shape
    bn = _row_block(n, block_rows)
    kernel = functools.partial(_typed_linear_kernel, num_types=t, activation=activation)
    return pl.pallas_call(
        kernel,
        out_shape=jax.ShapeDtypeStruct((n, dout), jnp.float32),
        grid=(n // bn,),
        in_specs=[
            pl.BlockSpec((bn, din), lambda i: (i, 0)),
            pl.BlockSpec((t, din, dout), lambda i: (0, 0, 0)),
            pl.BlockSpec((t, dout), lambda i: (0, 0)),
            pl.BlockSpec((bn, t), lambda i: (i, 0)),
        ],
        out_specs=pl.BlockSpec((bn, dout), lambda i: (i, 0)),
        compiler_params=_PARALLEL_1D,
    )(x, w.astype(jnp.bfloat16), b, type_mask)


def edge_relation(q_i, k_j, v_j, ratt_bd, rmsg_bd, head_pri, edge_mask, n_heads,
                  block_rows=512):
    e, n_hid = q_i.shape
    r = ratt_bd.shape[0]
    h = n_heads
    be = _row_block(e, block_rows)
    kernel = functools.partial(_edge_relation_kernel, num_relations=r)
    return pl.pallas_call(
        kernel,
        out_shape=(jax.ShapeDtypeStruct((e, h), jnp.float32),
                   jax.ShapeDtypeStruct((e, n_hid), jnp.float32)),
        grid=(e // be,),
        in_specs=[
            pl.BlockSpec((be, n_hid), lambda i: (i, 0)),
            pl.BlockSpec((be, n_hid), lambda i: (i, 0)),
            pl.BlockSpec((be, n_hid), lambda i: (i, 0)),
            pl.BlockSpec((r, n_hid, n_hid), lambda i: (0, 0, 0)),
            pl.BlockSpec((r, n_hid, n_hid), lambda i: (0, 0, 0)),
            pl.BlockSpec((r, n_hid, h), lambda i: (0, 0, 0)),
            pl.BlockSpec((be, r), lambda i: (i, 0)),
        ],
        out_specs=(pl.BlockSpec((be, h), lambda i: (i, 0)),
                   pl.BlockSpec((be, n_hid), lambda i: (i, 0))),
        compiler_params=_PARALLEL_1D,
    )(q_i, k_j, v_j, ratt_bd.astype(jnp.bfloat16), rmsg_bd.astype(jnp.bfloat16),
      head_pri, edge_mask)


def update_nodes(aggr, x_in, gate, a_w, a_b, type_mask, block_rows=512):
    n, dh = x_in.shape
    t = a_w.shape[0]
    bn = _row_block(n, block_rows)
    kernel = functools.partial(_update_kernel, num_types=t)
    return pl.pallas_call(
        kernel,
        out_shape=jax.ShapeDtypeStruct((n, dh), jnp.float32),
        grid=(n // bn,),
        in_specs=[
            pl.BlockSpec((bn, dh), lambda i: (i, 0)),
            pl.BlockSpec((bn, dh), lambda i: (i, 0)),
            pl.BlockSpec((bn, 1), lambda i: (i, 0)),
            pl.BlockSpec((t, dh, dh), lambda i: (0, 0, 0)),
            pl.BlockSpec((t, dh), lambda i: (0, 0)),
            pl.BlockSpec((bn, t), lambda i: (i, 0)),
        ],
        out_specs=pl.BlockSpec((bn, dh), lambda i: (i, 0)),
        compiler_params=_PARALLEL_1D,
    )(aggr, x_in, gate, a_w.astype(jnp.bfloat16), a_b, type_mask)


# ------------------------------- glue (JAX) ---------------------------------

def segment_softmax(scores, seg_ids, num_segments):
    # torch_geometric.utils.softmax semantics: per-target-node softmax over edges (f32).
    seg_max = jax.ops.segment_max(scores, seg_ids, num_segments=num_segments)
    seg_max = jnp.where(jnp.isfinite(seg_max), seg_max, 0.0)
    ex = jnp.exp(scores - seg_max[seg_ids])
    denom = jax.ops.segment_sum(ex, seg_ids, num_segments=num_segments)
    return ex / (denom[seg_ids] + 1e-16)


def _block_diag(rel):
    """(R, H, dk, dk) -> (R, H*dk, H*dk) block-diagonal (head h on diagonal block h)."""
    r, h, dk, _ = rel.shape
    eye_h = jnp.eye(h, dtype=rel.dtype)
    bd = rel[:, :, :, None, :] * eye_h[None, :, None, :, None]     # (R, H, dk, H, dk)
    return bd.reshape(r, h * dk, h * dk)


def _head_prior(pri_scaled, d_k):
    """(R, H) -> (R, H*dk, H) head-group summation matrix with prior folded in."""
    r, h = pri_scaled.shape
    sum_mat = jnp.repeat(jnp.eye(h, dtype=pri_scaled.dtype), d_k, axis=0)   # (H*dk, H)
    return sum_mat[None, :, :] * pri_scaled[:, None, :]


def _prepare_layer(layer, n_heads):
    n_hid = layer["k_w"].shape[1]
    d_k = n_hid // n_heads
    return {
        # fused K|Q|V projection weights: (T, n_hid, 3*n_hid)
        "kqv_w": jnp.concatenate([layer["k_w"], layer["q_w"], layer["v_w"]], axis=-1),
        "kqv_b": jnp.concatenate([layer["k_b"], layer["q_b"], layer["v_b"]], axis=-1),
        "rel_att_bd": _block_diag(layer["rel_att"]),
        "rel_msg_bd": _block_diag(layer["rel_msg"]),
        "head_pri": _head_prior(layer["rel_pri"] / math.sqrt(d_k), d_k),
        "a_w": layer["a_w"],
        "a_b": layer["a_b"],
        "skip": layer["skip"],
    }


def hgt_conv(prep, x, type_mask, src, dst, edge_mask, n_heads):
    n, n_hid = x.shape
    d_k = n_hid // n_heads
    e = src.shape[0]

    # Fused K/Q/V projection (one kernel launch, lane-dense 3*n_hid output).
    kqv = typed_linear(x, prep["kqv_w"], prep["kqv_b"], type_mask)
    k = kqv[:, :n_hid]
    q = kqv[:, n_hid:2 * n_hid]
    v = kqv[:, 2 * n_hid:]

    # Edge gathers stay as XLA glue (data-dependent indices).
    q_i = q[dst]            # (E, n_hid) target-node queries
    k_j = k[src]            # (E, n_hid) source-node keys
    v_j = v[src]            # (E, n_hid) source-node values

    att_scores, msg = edge_relation(q_i, k_j, v_j, prep["rel_att_bd"], prep["rel_msg_bd"],
                                    prep["head_pri"], edge_mask, n_heads)

    att = segment_softmax(att_scores, dst, n)                          # (E, H)
    weighted = (msg.reshape(e, n_heads, d_k) * att[:, :, None]).reshape(e, n_hid)
    aggr = jax.ops.segment_sum(weighted, dst, num_segments=n)          # (N, n_hid)

    # Per-node gate = sigmoid(skip[type[n]]) (one-hot select done once on the XLA side).
    gate = (type_mask @ jax.nn.sigmoid(prep["skip"]))[:, None]         # (N, 1)
    return update_nodes(aggr, x, gate, prep["a_w"], prep["a_b"], type_mask)


def hgt_net(params, node_features, node_type, edge_index, edge_type, *,
            num_types, num_relations, n_heads):
    type_mask = (node_type[:, None] == jnp.arange(num_types)[None, :]).astype(jnp.float32)
    edge_mask = (edge_type[:, None] == jnp.arange(num_relations)[None, :]).astype(jnp.float32)
    src, dst = edge_index[0], edge_index[1]

    # adapt_ws[t] + tanh per node type; dropout is identity in eval mode.
    h = typed_linear(node_features, params["adapt_w"], params["adapt_b"], type_mask,
                     activation="tanh")
    for layer in params["layers"]:
        prep = _prepare_layer(layer, n_heads)
        h = hgt_conv(prep, h, type_mask, src, dst, edge_mask, n_heads)
    return h


# ------------------------------ parameters ----------------------------------

def init_params(key, in_dim, n_hid, num_types, num_relations, n_heads, n_layers):
    d_k = n_hid // n_heads
    keys = jax.random.split(key, 2 + n_layers)

    def rnd(k, shape, scale):
        return (jax.random.normal(k, shape, jnp.float32) * scale).astype(jnp.float32)

    params = {
        "adapt_w": rnd(keys[0], (num_types, in_dim, n_hid), 1.0 / math.sqrt(in_dim)),
        "adapt_b": rnd(keys[1], (num_types, n_hid), 0.01),
        "layers": [],
    }
    for li in range(n_layers):
        lk = jax.random.split(keys[2 + li], 10)
        layer = {
            "k_w": rnd(lk[0], (num_types, n_hid, n_hid), 1.0 / math.sqrt(n_hid)),
            "k_b": rnd(lk[1], (num_types, n_hid), 0.01),
            "q_w": rnd(lk[2], (num_types, n_hid, n_hid), 1.0 / math.sqrt(n_hid)),
            "q_b": rnd(lk[3], (num_types, n_hid), 0.01),
            "v_w": rnd(lk[4], (num_types, n_hid, n_hid), 1.0 / math.sqrt(n_hid)),
            "v_b": rnd(lk[5], (num_types, n_hid), 0.01),
            "a_w": rnd(lk[6], (num_types, n_hid, n_hid), 1.0 / math.sqrt(n_hid)),
            "a_b": rnd(lk[7], (num_types, n_hid), 0.01),
            "rel_att": rnd(lk[8], (num_relations, n_heads, d_k, d_k), 1.0 / math.sqrt(d_k)),
            "rel_msg": rnd(lk[9], (num_relations, n_heads, d_k, d_k), 1.0 / math.sqrt(d_k)),
            "rel_pri": jnp.ones((num_relations, n_heads), jnp.float32),
            "skip": jnp.ones((num_types,), jnp.float32),
        }
        params["layers"].append(layer)
    return params


# --------------------------------- main --------------------------------------

if __name__ == "__main__":
    in_dim, n_hid = 16, 32
    num_types, num_relations = 3, 2
    n_heads, n_layers = 4, 2
    N, E = 16, 48

    key = jax.random.PRNGKey(0)
    kp, kx, kt, ks, kd, ke = jax.random.split(key, 6)

    params = init_params(kp, in_dim, n_hid, num_types, num_relations, n_heads, n_layers)
    node_features = jax.random.normal(kx, (N, in_dim), jnp.float32)
    node_type = jax.random.randint(kt, (N,), 0, num_types, jnp.int32)
    src = jax.random.randint(ks, (E,), 0, N, jnp.int32)
    dst = jax.random.randint(kd, (E,), 0, N, jnp.int32)
    edge_index = jnp.stack([src, dst], axis=0)      # edge_index[0]=source, [1]=target
    edge_type = jax.random.randint(ke, (E,), 0, num_relations, jnp.int32)

    out = hgt_net(params, node_features, node_type, edge_index, edge_type,
                  num_types=num_types, num_relations=num_relations, n_heads=n_heads)
    out = jax.block_until_ready(out)

    assert out.shape == (N, n_hid)
    assert bool(jnp.all(jnp.isfinite(out)))
    print("KERNEL_OK")
</pallas_src>

<mosaic_0001>
module attributes {stable_mosaic.version = 11 : i64} {
  func.func @_typed_linear_kernel(%arg0: i32, %arg1: memref<16x16xf32, #tpu.memory_space<vmem>>, %arg2: memref<3x16x32xbf16, #tpu.memory_space<vmem>>, %arg3: memref<3x32xf32, #tpu.memory_space<vmem>>, %arg4: memref<16x3xf32, #tpu.memory_space<vmem>>, %arg5: memref<16x32xf32, #tpu.memory_space<vmem>>) attributes {dimension_semantics = [#tpu.dimension_semantics<parallel>], iteration_bounds = array<i64: 1>, scalar_prefetch = 0 : i64, scratch_operands = 0 : i64, tpu.core_type = #tpu.core_type<tc>, window_params = [{transform_indices = @transform_0, window_bounds = array<i64: 16, 16>}, {pipeline_mode = #tpu.pipeline_mode<synchronous>, transform_indices = @transform_1, window_bounds = array<i64: 3, 16, 32>}, {pipeline_mode = #tpu.pipeline_mode<synchronous>, transform_indices = @transform_2, window_bounds = array<i64: 3, 32>}, {transform_indices = @transform_3, window_bounds = array<i64: 16, 3>}, {transform_indices = @transform_4, window_bounds = array<i64: 16, 32>}]} {
    %c0 = arith.constant 0 : index
    %c0_0 = arith.constant 0 : index
    %0 = vector.load %arg1[%c0, %c0_0] : memref<16x16xf32, #tpu.memory_space<vmem>>, vector<16x16xf32>
    %1 = arith.truncf %0 : vector<16x16xf32> to vector<16x16xbf16>
    %c0_1 = arith.constant 0 : index
    %c0_2 = arith.constant 0 : index
    %2 = vector.load %arg4[%c0_1, %c0_2] : memref<16x3xf32, #tpu.memory_space<vmem>>, vector<16x3xf32>
    %c0_3 = arith.constant 0 : index
    %c0_4 = arith.constant 0 : index
    %c0_5 = arith.constant 0 : index
    %3 = vector.load %arg2[%c0_3, %c0_4, %c0_5] : memref<3x16x32xbf16, #tpu.memory_space<vmem>>, vector<1x16x32xbf16>
    %4 = vector.shape_cast %3 : vector<1x16x32xbf16> to vector<16x32xbf16>
    %cst = arith.constant dense<0.000000e+00> : vector<16x32xf32>
    %5 = tpu.matmul %1, %4, %cst {dimension_numbers = #tpu.dot_dimension_numbers<[1], [0], [0], [1], [0, 0, 1, 1], [], []>} : vector<16x16xbf16>, vector<16x32xbf16>, vector<16x32xf32> -> vector<16x32xf32>
    %c0_6 = arith.constant 0 : index
    %c0_7 = arith.constant 0 : index
    %6 = vector.load %arg3[%c0_6, %c0_7] : memref<3x32xf32, #tpu.memory_space<vmem>>, vector<1x32xf32>
    %7 = vector.broadcast %6 : vector<1x32xf32> to vector<16x32xf32>
    %8 = arith.addf %5, %7 : vector<16x32xf32>
    %9 = math.tanh %8 : vector<16x32xf32>
    %10 = vector.extract_strided_slice %2 {offsets = [0, 0], sizes = [16, 1], strides = [1, 1]} : vector<16x3xf32> to vector<16x1xf32>
    %11 = vector.broadcast %10 : vector<16x1xf32> to vector<16x32xf32>
    %12 = arith.mulf %11, %9 : vector<16x32xf32>
    %c1 = arith.constant 1 : index
    %c0_8 = arith.constant 0 : index
    %c0_9 = arith.constant 0 : index
    %13 = vector.load %arg2[%c1, %c0_8, %c0_9] : memref<3x16x32xbf16, #tpu.memory_space<vmem>>, vector<1x16x32xbf16>
    %14 = vector.shape_cast %13 : vector<1x16x32xbf16> to vector<16x32xbf16>
    %cst_10 = arith.constant dense<0.000000e+00> : vector<16x32xf32>
    %15 = tpu.matmul %1, %14, %cst_10 {dimension_numbers = #tpu.dot_dimension_numbers<[1], [0], [0], [1], [0, 0, 1, 1], [], []>} : vector<16x16xbf16>, vector<16x32xbf16>, vector<16x32xf32> -> vector<16x32xf32>
    %c1_11 = arith.constant 1 : index
    %c0_12 = arith.constant 0 : index
    %16 = vector.load %arg3[%c1_11, %c0_12] : memref<3x32xf32, #tpu.memory_space<vmem>>, vector<1x32xf32>
    %17 = vector.broadcast %16 : vector<1x32xf32> to vector<16x32xf32>
    %18 = arith.addf %15, %17 : vector<16x32xf32>
    %19 = math.tanh %18 : vector<16x32xf32>
    %20 = vector.extract_strided_slice %2 {offsets = [0, 1], sizes = [16, 1], strides = [1, 1]} : vector<16x3xf32> to vector<16x1xf32>
    %21 = vector.broadcast %20 : vector<16x1xf32> to vector<16x32xf32>
    %22 = arith.mulf %21, %19 : vector<16x32xf32>
    %23 = arith.addf %12, %22 : vector<16x32xf32>
    %c2 = arith.constant 2 : index
    %c0_13 = arith.constant 0 : index
    %c0_14 = arith.constant 0 : index
    %24 = vector.load %arg2[%c2, %c0_13, %c0_14] : memref<3x16x32xbf16, #tpu.memory_space<vmem>>, vector<1x16x32xbf16>
    %25 = vector.shape_cast %24 : vector<1x16x32xbf16> to vector<16x32xbf16>
    %cst_15 = arith.constant dense<0.000000e+00> : vector<16x32xf32>
    %26 = tpu.matmul %1, %25, %cst_15 {dimension_numbers = #tpu.dot_dimension_numbers<[1], [0], [0], [1], [0, 0, 1, 1], [], []>} : vector<16x16xbf16>, vector<16x32xbf16>, vector<16x32xf32> -> vector<16x32xf32>
    %c2_16 = arith.constant 2 : index
    %c0_17 = arith.constant 0 : index
    %27 = vector.load %arg3[%c2_16, %c0_17] : memref<3x32xf32, #tpu.memory_space<vmem>>, vector<1x32xf32>
    %28 = vector.broadcast %27 : vector<1x32xf32> to vector<16x32xf32>
    %29 = arith.addf %26, %28 : vector<16x32xf32>
    %30 = math.tanh %29 : vector<16x32xf32>
    %31 = vector.extract_strided_slice %2 {offsets = [0, 2], sizes = [16, 1], strides = [1, 1]} : vector<16x3xf32> to vector<16x1xf32>
    %32 = vector.broadcast %31 : vector<16x1xf32> to vector<16x32xf32>
    %33 = arith.mulf %32, %30 : vector<16x32xf32>
    %34 = arith.addf %23, %33 : vector<16x32xf32>
    %c0_18 = arith.constant 0 : index
    %c0_19 = arith.constant 0 : index
    %35 = vector.load %arg5[%c0_18, %c0_19] : memref<16x32xf32, #tpu.memory_space<vmem>>, vector<16x32xf32>
    tpu.vector_store %arg5[%c0_18, %c0_19], %34 {strides = array<i32>} : memref<16x32xf32, #tpu.memory_space<vmem>>, vector<16x32xf32>,
    return
  }
  func.func @transform_0(%arg0: i32) -> (i32, i32) {
    %c0_i32 = arith.constant 0 : i32
    %c0_i32_0 = arith.constant 0 : i32
    return %arg0, %c0_i32 : i32, i32
  }
  func.func @transform_1(%arg0: i32) -> (i32, i32, i32) {
    %c0_i32 = arith.constant 0 : i32
    %c0_i32_0 = arith.constant 0 : i32
    %c0_i32_1 = arith.constant 0 : i32
    %c0_i32_2 = arith.constant 0 : i32
    return %c0_i32, %c0_i32_0, %c0_i32_1 : i32, i32, i32
  }
  func.func @transform_2(%arg0: i32) -> (i32, i32) {
    %c0_i32 = arith.constant 0 : i32
    %c0_i32_0 = arith.constant 0 : i32
    %c0_i32_1 = arith.constant 0 : i32
    return %c0_i32, %c0_i32_0 : i32, i32
  }
  func.func @transform_3(%arg0: i32) -> (i32, i32) {
    %c0_i32 = arith.constant 0 : i32
    %c0_i32_0 = arith.constant 0 : i32
    return %arg0, %c0_i32 : i32, i32
  }
  func.func @transform_4(%arg0: i32) -> (i32, i32) {
    %c0_i32 = arith.constant 0 : i32
    %c0_i32_0 = arith.constant 0 : i32
    return %arg0, %c0_i32 : i32, i32
  }
}

</mosaic_0001>

<bundles_post_ra>
// kernel: tpu_custom_call.1
= control target key start
LH: loop header
LB: loop body
LE: loop exit
PB: predicated region body
PF: predicated region fallthrough
CT: control target
= control target key end

     0   :  { %9 = vsyncpa [#allocation3], 0  ;;  %s343_s0 = inlined_call_operand.vmem [shape: f32[16,16], index: 0, kind: input, shape index: {}]   ;;  %s344_s1 = inlined_call_operand.hbm [shape: bf16[3,16,32], index: 1, kind: input, shape index: {}]   ;;  %s345_s2 = inlined_call_operand.vmem [shape: f32[3,32], index: 2, kind: input, shape index: {}]   ;;  %s346_s3 = inlined_call_operand.vmem [shape: f32[16,3], index: 3, kind: input, shape index: {}]   ;;  %s347_s4 = inlined_call_operand.hbm [shape: f32[16,32], index: 4, kind: output, shape index: {}]  }
   0x1   :  { %10 = vsyncpa [#allocation4], 0  ;;  %s17_s17 = sshll.u32 %s344_s1, 4  ;;  %s280_s18 = smov [#allocation2]   ;;  %s18_s17 = int_to_ptr.hbm [resolvable:$true] %s17_s17 }
   0x2   :  { %s19_s19 = sshll.u32 %s280_s18, 4  ;;  %s281_s20 = smov 64   ;;  %s20_s19 = int_to_ptr.vmem [resolvable:$true] %s19_s19 }
   0x3   :  { %s282_s21 = smov 4  }
   0x4   :  { %25 = dma.hbm_to_vmem [thread:$0]  %s18_s17, 384, %s20_s19, [#allocation3], %s281_s20, %s281_s20, %s282_s21  }
   0x5   :  { %276 = dma.done.wait [#allocation3], 384  }
   0x6   :  { %277 = vsyncadd [#allocation3], 4294966912  ;;  %v283_v0 = vmov 1   ;;  %v284_v1 = vmov 0   ;;  %v285_v2 = vmov 2   ;;  %v197_v3 = vld [vmem:[#allocation2] sm:$0xff] }
   0x7   :  { %210 = vset.pattern.permute.xlu1 %v283_v0  ;;  %209 = vset.pattern.permute.xlu0 %v284_v1  ;;  %v198_v4 = vld [vmem:[#allocation2 + $0x8] sm:$0xff]  ;;  %v199_v5 = vld [vmem:[#allocation2 + $0x10] sm:$0xff]  ;;  %v35_v6 = vld [vmem:[%s343_s0] sm:$0xff]  ;;  %vm50_vm0 = vcmask 130048   ;;  %vm160_vm1 = vcmask 261120   ;;  %s169_s10 = sshll.u32 %s347_s4, 4  ;;  %s170_s10 = int_to_ptr.hbm [resolvable:$true] %s169_s10 }
   0x8   :  { %211 = vset.pattern.permute.xlu2 %v285_v2  ;;  %v36_v7 = vld [vmem:[%s343_s0 + $0x8] sm:$0xff]  ;;  %v38_v8 = vld [vmem:[%s346_s3] sm:$0xff]  ;;  %61 = vmatpush.bf16.msra.mxu0 %v197_v3  ;;  %s287_s11 = smov 128   ;;  %s288_s12 = smov 8  }
   0x9   :  { %100 = vmatpush.bf16.msra.mxu1 %v198_v4  ;;  %v37_v9 = vpack.c.bf16 %v36_v7, %v35_v6  ;;  %139 = vmatpush.bf16.msra.mxu2 %v199_v5  ;;  %v39_v10 = vld [vmem:[%s346_s3 + $0x8] sm:$0xff]  ;;  %v213_v11 = vld [vmem:[%s345_s2] ss:$0 sm:$0xff]  ;;  %v214_v12 = vld [vmem:[%s345_s2 + $0x1] ss:$0 sm:$0xff] }
   0xa   :  { %110 = vperm.xlu1 %210, %v38_v8   ;;  %72 = vperm.xlu0 %209, %v38_v8   ;;  %v215_v17 = vld [vmem:[%s345_s2 + $0x2] ss:$0 sm:$0xff]  ;;  %s286_s2 = smov [#allocation5]  }
   0xb   :  { %149 = vperm.xlu2 %211, %v38_v8   ;;  %186 = vmatmul.msk.bf16.vlgmr.msra.gmra.mxu0 %vm50_vm0, %v37_v9  ;;  %s167_s7 = sshll.u32 %s286_s2, 4  ;;  %s168_s7 = int_to_ptr.vmem [resolvable:$true] %s167_s7 }
   0xc   :  { %191 = vmatmul.msk.bf16.vlgmr.msra.gmra.mxu1 %vm50_vm0, %v37_v9  ;;  %196 = vmatmul.msk.bf16.vlgmr.msra.gmra.mxu2 %vm50_vm0, %v37_v9 }
  0x12   :  { %114 = vperm.xlu1 %210, %v39_v10   ;;  %77 = vperm.xlu0 %209, %v39_v10  }
  0x13   :  { %153 = vperm.xlu2 %211, %v39_v10  }
  0x1a   :  { %212 = vset.pattern.permute.xlu0 %v285_v2 }
  0x65   :  { %v150_v30 = vpop.permute.xlu2 %149 }
  0x6d   :  { %v154_v44 = vpop.permute.xlu2 %153 }
  0x7c   :  { %v111_v26 = vpop.permute.xlu1 %110  ;;  %v73_v27 = vpop.permute.xlu0 %72 }
  0x84   :  { %v115_v39 = vpop.permute.xlu1 %114  ;;  %v78_v40 = vpop.permute.xlu0 %77 }
  0x88   :  { %v63_v13 = vpop.f32.mrf.mxu0 }
  0x89   :  { %v102_v14 = vpop.f32.mrf.mxu1  ;;  %v64_v15 = vadd.f32 %v213_v11, %v63_v13 }
  0x8a   :  { %v103_v16 = vadd.f32 %v214_v12, %v102_v14 }
  0x8b   :  { %216 = vtanh.f32 %v64_v15 }
  0x8c   :  { %218 = vtanh.f32 %v103_v16 }
  0x8f   :  { %v141_v18 = vpop.f32.mrf.mxu2 }
  0x90   :  { %v142_v19 = vadd.f32 %v215_v17, %v141_v18  ;;  %v65_v20 = vpop.f32.mrf.mxu0 }
  0x91   :  { %v104_v21 = vpop.f32.mrf.mxu1  ;;  %v217_v22 = vpop.eup %216  ;;  %v66_v23 = vadd.f32 %v213_v11, %v65_v20 }
  0x92   :  { %v105_v24 = vadd.f32 %v214_v12, %v104_v21  ;;  %v219_v25 = vpop.eup %218  ;;  %220 = vtanh.f32 %v142_v19  ;;  %v80_v29 = vmul.f32 %v217_v22, %v73_v27 }
  0x93   :  { %v117_v28 = vmul.f32 %v219_v25, %v111_v26  ;;  %222 = vtanh.f32 %v66_v23 }
  0x94   :  { %224 = vtanh.f32 %v105_v24 }
  0x95   :  { %v119_v31 = vadd.f32 %v117_v28, %v80_v29 }
  0x97   :  { %v143_v32 = vpop.f32.mrf.mxu2 }
  0x98   :  { %v221_v33 = vpop.eup %220  ;;  %v144_v34 = vadd.f32 %v215_v17, %v143_v32 }
  0x99   :  { %v223_v35 = vpop.eup %222  ;;  %v156_v36 = vmul.f32 %v221_v33, %v150_v30 }
  0x9a   :  { %v225_v37 = vpop.eup %224  ;;  %226 = vtanh.f32 %v144_v34  ;;  %v81_v42 = vmul.f32 %v223_v35, %v78_v40 }
  0x9b   :  { %v158_v38 = vadd.f32 %v156_v36, %v119_v31  ;;  %v118_v41 = vmul.f32 %v225_v37, %v115_v39 }
  0x9d   :  { %161 = vst.msk [vmem:[#allocation5] sm:$0xff] %vm160_vm1, %v158_v38  ;;  %v120_v45 = vadd.f32 %v118_v41, %v81_v42 }
  0xa0   :  { %v227_v43 = vpop.eup %226 }
  0xa1   :  { %v157_v46 = vmul.f32 %v227_v43, %v154_v44 }
  0xa3   :  { %v159_v47 = vadd.f32 %v157_v46, %v120_v45 }
  0xa5   :  { %162 = vst.msk [vmem:[#allocation5 + $0x8] sm:$0xff] %vm160_vm1, %v159_v47 }
  0xa6   :  { %175 = dma.vmem_to_hbm [thread:$0]  %s168_s7, 256, %s170_s10, [#allocation4], %s287_s11, %s287_s11, %s288_s12  }
  0xa7   :  { %278 = dma.done.wait [#allocation4], 256  }
  0xa8   :  { %279 = vsyncadd [#allocation4], 4294967040 }
  0xa9   :  { %180 = vsyncpa [#allocation3], 1 }
  0xaa   :  { %181 = vsyncpa [#allocation4], 1 }

</bundles_post_ra>
